<compile_context>
chip_gen: v5e
topology: v5e:2x2
jax: 0.10.0
libtpu: 0.0.40
codegen_flags: <defaults>
</compile_context>

<pallas_src>
import functools

import jax
import jax.numpy as jnp
from jax import lax
from jax.experimental import pallas as pl
from jax.experimental.pallas import tpu as pltpu


# ---------------------------------------------------------------------------
# Generation-aware VMEM budgeting
# ---------------------------------------------------------------------------
def _vmem_capacity_bytes():
    try:
        return int(pltpu.get_tpu_info().vmem_capacity_bytes)
    except Exception:                      # unknown chip / interpret: assume v7x
        return 64 * 1024 * 1024


_VMEM_CAP = _vmem_capacity_bytes()
_VMEM_LIMIT_CAP = (_VMEM_CAP * 3) // 4            # leave headroom for Mosaic
_TILE_BUDGET_BYTES = min(32 * 1024 * 1024, _VMEM_CAP // 8)   # 16 MiB v5e/v6e, 8 MiB v7x


def _vmem_limit(need_bytes):
    limit = max(2 * need_bytes, 32 * 1024 * 1024)
    return int(min(limit, _VMEM_LIMIT_CAP))


# ---------------------------------------------------------------------------
# Tiling helpers
# ---------------------------------------------------------------------------
def _round_tk(tk):
    """MXU-friendly K-tile rounding: multiples of 256 preferred, 128 minimum."""
    if tk >= 256:
        return (tk // 256) * 256
    return max(128, (tk // 128) * 128)


def _choose_tk(M, K, itemsize):
    """Largest MXU-friendly K tile s.t. two (M, tk) input buffers fit the budget."""
    tk = _TILE_BUDGET_BYTES // max(1, 2 * M * itemsize)
    tk = _round_tk(max(128, tk))
    return K if tk >= K else tk


def _prep_features(x, tk):
    """NCHW -> (M, K) features in native dtype, zero-padded to a multiple of tk."""
    a, b, c, d = x.shape
    M, K = a * b, c * d
    feats = x.reshape(M, K)
    if tk is None:
        tk = _choose_tk(M, K, feats.dtype.itemsize)
    if tk >= K:
        tk = K                            # single full-extent K block
    elif tk % 128 != 0:
        raise ValueError("tk must be a multiple of 128 when smaller than K")
    n_k = pl.cdiv(K, tk)
    k_pad = n_k * tk
    if k_pad != K:
        # zero columns do not change X @ X.T
        feats = jnp.pad(feats, ((0, 0), (0, k_pad - K)))
    return feats, M, tk, n_k


def _choose_tm_fused(M, itemsize, tk):
    """Row-slab size for the fused loss kernel: tm = M unless VMEM would overflow."""
    budget = _VMEM_LIMIT_CAP - 2 * M * tk * itemsize - (4 << 20)
    if 3 * M * M * 4 <= budget:           # acc + target slab(s) comfortably fit
        return M
    tm = budget // (3 * M * 4)
    tm = min(M, max(8, (tm // 8) * 8))
    while tm > 8 and M % tm != 0:
        tm -= 8
    if tm <= 0 or M % tm != 0:
        tm = M                            # TODO(synk): pad M for awkward slab sizes
    return tm


# ---------------------------------------------------------------------------
# Pallas kernels
# ---------------------------------------------------------------------------
def _gram_kernel(x_ref, g_ref, *, scale, n_k):
    """G = scale * X @ X.T, accumulated directly into the resident f32 output."""
    k = pl.program_id(0)

    @pl.when(k == 0)
    def _():
        g_ref[...] = jnp.zeros_like(g_ref)

    x = x_ref[...]                                        # (M, tk), native dtype
    g_ref[...] += lax.dot_general(
        x, x,
        dimension_numbers=(((1,), (1,)), ((), ())),
        preferred_element_type=jnp.float32)

    @pl.when(k == n_k - 1)
    def _():
        g_ref[...] = g_ref[...] * scale


def _gram_mse_kernel(x_ref, t_ref, loss_ref, acc_ref, *,
                     scale, inv_n, tm, n_m, n_k):
    """Fused: accumulate a (tm, M) gram slab over K tiles, reduce MSE into loss."""
    i = pl.program_id(0)            # gram row slab (outer)
    k = pl.program_id(1)            # contraction tile (inner)

    @pl.when(jnp.logical_and(i == 0, k == 0))
    def _():
        loss_ref[...] = jnp.zeros_like(loss_ref)

    @pl.when(k == 0)
    def _():
        acc_ref[...] = jnp.zeros_like(acc_ref)

    rhs = x_ref[...]                                      # (M, tk), native dtype
    if n_m == 1:
        lhs = rhs
    else:
        lhs = x_ref[pl.ds(pl.multiple_of(i * tm, tm), tm), :]   # (tm, tk) row slice

    acc_ref[...] += lax.dot_general(
        lhs, rhs,
        dimension_numbers=(((1,), (1,)), ((), ())),
        preferred_element_type=jnp.float32)

    @pl.when(k == n_k - 1)
    def _():
        d = acc_ref[...] * scale - t_ref[...]
        loss_ref[...] += jnp.sum(d * d, keepdims=True) * inv_n


# ---------------------------------------------------------------------------
# Wrappers
# ---------------------------------------------------------------------------
def gram_matrix(x, *, tk=None):
    """Equivalent of gram_matrix_ori: NCHW -> (N*C, N*C) gram / (N*C*H*W), f32."""
    a, b, c, d = x.shape
    feats, M, tk, n_k = _prep_features(x, tk)
    scale = 1.0 / float(a * b * c * d)

    # double-buffered (M, tk) feature tiles + resident (M, M) f32 output
    need = 2 * M * tk * feats.dtype.itemsize + M * M * 4

    return pl.pallas_call(
        functools.partial(_gram_kernel, scale=scale, n_k=n_k),
        out_shape=jax.ShapeDtypeStruct((M, M), jnp.float32),
        grid_spec=pltpu.PrefetchScalarGridSpec(
            num_scalar_prefetch=0,
            grid=(n_k,),
            in_specs=[pl.BlockSpec((M, tk), lambda k: (0, k))],
            out_specs=pl.BlockSpec((M, M), lambda k: (0, 0))),
        compiler_params=pltpu.CompilerParams(
            dimension_semantics=("arbitrary",),
            vmem_limit_bytes=_vmem_limit(need)),
    )(feats)


def style_mse_loss(x, target_gram, *, tk=None):
    """mean((gram_matrix(x) - target_gram)**2); the gram of x never leaves VMEM."""
    a, b, c, d = x.shape
    feats, M, tk, n_k = _prep_features(x, tk)
    scale = 1.0 / float(a * b * c * d)
    inv_n = 1.0 / float(M * M)
    target_gram = target_gram.astype(jnp.float32)

    tm = _choose_tm_fused(M, feats.dtype.itemsize, tk)
    n_m = M // tm

    if n_m == 1:
        # Constant (0, 0) index: no point double-buffering the target block.
        t_spec = pl.BlockSpec((tm, M), lambda i, k: (i, 0),
                              pipeline_mode=pl.Buffered(1))
        t_bufs = 1
    else:
        t_spec = pl.BlockSpec((tm, M), lambda i, k: (i, 0))
        t_bufs = 2

    need = (2 * M * tk * feats.dtype.itemsize     # double-buffered feature tiles
            + t_bufs * tm * M * 4                 # target slab(s)
            + tm * M * 4)                         # f32 accumulator scratch

    out = pl.pallas_call(
        functools.partial(_gram_mse_kernel, scale=scale, inv_n=inv_n,
                          tm=tm, n_m=n_m, n_k=n_k),
        out_shape=jax.ShapeDtypeStruct((1, 1), jnp.float32),
        grid_spec=pltpu.PrefetchScalarGridSpec(
            num_scalar_prefetch=0,
            grid=(n_m, n_k),
            in_specs=[pl.BlockSpec((M, tk), lambda i, k: (0, k)), t_spec],
            out_specs=pl.BlockSpec((1, 1), lambda i, k: (0, 0)),
            scratch_shapes=[pltpu.VMEM((tm, M), jnp.float32)]),
        compiler_params=pltpu.CompilerParams(
            dimension_semantics=("arbitrary", "arbitrary"),
            vmem_limit_bytes=_vmem_limit(need)),
    )(feats, target_gram)
    return out[0, 0]


class StyleLoss:
    """JAX/Pallas port of the PyTorch StyleLoss module.

    __init__ precomputes the ("detached") gram matrix of the target feature.
    forward() computes self.loss = mse(gram(input), target) with a fused Pallas
    kernel and returns the input unchanged (identity pass-through), exactly
    like the PyTorch module.
    """

    def __init__(self, target_feature):
        self.target = jax.lax.stop_gradient(gram_matrix(target_feature))
        self.loss = None

    def forward(self, x):
        self.loss = style_mse_loss(x, self.target)
        return x

    __call__ = forward


# ---------------------------------------------------------------------------
# Pure-JAX reference for sanity checks
# ---------------------------------------------------------------------------
def _gram_ref(x):
    a, b, c, d = x.shape
    f = x.reshape(a * b, c * d).astype(jnp.float32)
    return (f @ f.T) / float(a * b * c * d)


def _loss_ref(x, t):
    return jnp.mean((_gram_ref(x) - _gram_ref(t)) ** 2)


if __name__ == "__main__":
    key = jax.random.PRNGKey(0)
    k_t, k_x, k_t2, k_x2 = jax.random.split(key, 4)

    # --- primary shape: batch=2, channels=4, spatial=16x16 (NCHW) -----------
    target_feature = jax.random.normal(k_t, (2, 4, 16, 16), dtype=jnp.float32)
    x = jax.random.normal(k_x, (2, 4, 16, 16), dtype=jnp.float32)

    style = StyleLoss(target_feature)
    out = jax.block_until_ready(style(x))
    loss = jax.block_until_ready(style.loss)
    loss_ref = _loss_ref(x, target_feature)

    assert out.shape == x.shape and jnp.allclose(out, x), "forward must be identity"
    assert jnp.allclose(loss, loss_ref, rtol=1e-5, atol=1e-6), (loss, loss_ref)

    # --- exercise the K-tiled accumulation path (K=256, tk=128 -> 2 steps) --
    g_tiled = jax.block_until_ready(gram_matrix(x, tk=128))
    assert jnp.allclose(g_tiled, _gram_ref(x), rtol=2e-2, atol=1e-5)
    loss_tiled = jax.block_until_ready(
        style_mse_loss(x, gram_matrix(target_feature), tk=128))
    assert jnp.allclose(loss_tiled, loss_ref, rtol=1e-4, atol=1e-6)

    # --- larger shape: M = 512 gram, single resident output block -----------
    tf2 = jax.random.normal(k_t2, (4, 128, 16, 16), dtype=jnp.float32)
    x2 = jax.random.normal(k_x2, (4, 128, 16, 16), dtype=jnp.float32)
    g2 = jax.block_until_ready(gram_matrix(x2, tk=128))
    assert jnp.allclose(g2, _gram_ref(x2), rtol=2e-2, atol=1e-6)
    style2 = StyleLoss(tf2)
    _ = style2(x2)
    l2 = jax.block_until_ready(style2.loss)
    assert jnp.allclose(l2, _loss_ref(x2, tf2), rtol=5e-2), (l2, _loss_ref(x2, tf2))

    # --- bf16 inputs: half the HBM traffic, f32 accumulation on the MXU -----
    style_bf = StyleLoss(target_feature.astype(jnp.bfloat16))
    _ = style_bf(x.astype(jnp.bfloat16))
    l_bf = jax.block_until_ready(style_bf.loss)
    assert jnp.allclose(l_bf, loss_ref, rtol=1e-1), (l_bf, loss_ref)

    print("KERNEL_OK")
</pallas_src>

<mosaic_0001>
module attributes {stable_mosaic.version = 11 : i64} {
  func.func @_gram_kernel(%arg0: i32, %arg1: memref<8x256xf32, #tpu.memory_space<vmem>>, %arg2: memref<8x8xf32, #tpu.memory_space<vmem>>) attributes {dimension_semantics = [#tpu.dimension_semantics<arbitrary>], iteration_bounds = array<i64: 1>, scalar_prefetch = 0 : i64, scratch_operands = 0 : i64, tpu.core_type = #tpu.core_type<tc>, window_params = [{transform_indices = @transform_0, window_bounds = array<i64: 8, 256>}, {pipeline_mode = #tpu.pipeline_mode<synchronous>, transform_indices = @transform_1, window_bounds = array<i64: 8, 8>}]} {
    %c0_i32 = arith.constant 0 : i32
    %0 = arith.cmpi eq, %arg0, %c0_i32 : i32
    %1 = arith.extui %0 : i1 to i32
    %c0_i32_0 = arith.constant 0 : i32
    %2 = arith.cmpi ne, %1, %c0_i32_0 : i32
    scf.if %2 {
      %cst_8 = arith.constant 0.000000e+00 : f32
      %11 = vector.broadcast %cst_8 : f32 to vector<8x8xf32>
      %c0_9 = arith.constant 0 : index
      %c0_10 = arith.constant 0 : index
      %12 = vector.load %arg2[%c0_9, %c0_10] : memref<8x8xf32, #tpu.memory_space<vmem>>, vector<8x8xf32>
      tpu.vector_store %arg2[%c0_9, %c0_10], %11 {strides = array<i32>} : memref<8x8xf32, #tpu.memory_space<vmem>>, vector<8x8xf32>,
    } else {
    }
    %c0 = arith.constant 0 : index
    %c0_1 = arith.constant 0 : index
    %3 = vector.load %arg1[%c0, %c0_1] : memref<8x256xf32, #tpu.memory_space<vmem>>, vector<8x256xf32>
    %c0_2 = arith.constant 0 : index
    %c0_3 = arith.constant 0 : index
    %4 = vector.load %arg2[%c0_2, %c0_3] : memref<8x8xf32, #tpu.memory_space<vmem>>, vector<8x8xf32>
    %cst = arith.constant dense<0.000000e+00> : vector<8x8xf32>
    %5 = tpu.matmul %3, %3, %cst {dimension_numbers = #tpu.dot_dimension_numbers<[1], [1], [0], [0], [0, 0, 1, 0], [], []>} : vector<8x256xf32>, vector<8x256xf32>, vector<8x8xf32> -> vector<8x8xf32>
    %6 = arith.addf %4, %5 : vector<8x8xf32>
    %c0_4 = arith.constant 0 : index
    %c0_5 = arith.constant 0 : index
    %7 = vector.load %arg2[%c0_4, %c0_5] : memref<8x8xf32, #tpu.memory_space<vmem>>, vector<8x8xf32>
    tpu.vector_store %arg2[%c0_4, %c0_5], %6 {strides = array<i32>} : memref<8x8xf32, #tpu.memory_space<vmem>>, vector<8x8xf32>,
    %c0_i32_6 = arith.constant 0 : i32
    %8 = arith.cmpi eq, %arg0, %c0_i32_6 : i32
    %9 = arith.extui %8 : i1 to i32
    %c0_i32_7 = arith.constant 0 : i32
    %10 = arith.cmpi ne, %9, %c0_i32_7 : i32
    scf.if %10 {
      %c0_8 = arith.constant 0 : index
      %c0_9 = arith.constant 0 : index
      %11 = vector.load %arg2[%c0_8, %c0_9] : memref<8x8xf32, #tpu.memory_space<vmem>>, vector<8x8xf32>
      %cst_10 = arith.constant 4.8828125E-4 : f32
      %12 = vector.broadcast %cst_10 : f32 to vector<8x8xf32>
      %13 = arith.mulf %11, %12 : vector<8x8xf32>
      %c0_11 = arith.constant 0 : index
      %c0_12 = arith.constant 0 : index
      %14 = vector.load %arg2[%c0_11, %c0_12] : memref<8x8xf32, #tpu.memory_space<vmem>>, vector<8x8xf32>
      tpu.vector_store %arg2[%c0_11, %c0_12], %13 {strides = array<i32>} : memref<8x8xf32, #tpu.memory_space<vmem>>, vector<8x8xf32>,
    } else {
    }
    return
  }
  func.func @transform_0(%arg0: i32) -> (i32, i32) {
    %c0_i32 = arith.constant 0 : i32
    %c0_i32_0 = arith.constant 0 : i32
    return %c0_i32, %arg0 : i32, i32
  }
  func.func @transform_1(%arg0: i32) -> (i32, i32) {
    %c0_i32 = arith.constant 0 : i32
    %c0_i32_0 = arith.constant 0 : i32
    %c0_i32_1 = arith.constant 0 : i32
    return %c0_i32, %c0_i32_0 : i32, i32
  }
}

</mosaic_0001>

<bundles_post_ra>
// kernel: tpu_custom_call.1
= control target key start
LH: loop header
LB: loop body
LE: loop exit
PB: predicated region body
PF: predicated region fallthrough
CT: control target
= control target key end

     0   :  { %6 = vsyncpa [#allocation3], 0  ;;  %s175_s0 = inlined_call_operand.hbm [shape: f32[8,256], index: 0, kind: input, shape index: {}]   ;;  %s176_s1 = inlined_call_operand.hbm [shape: f32[8,8], index: 1, kind: output, shape index: {}]  }
   0x1   :  { %7 = vsyncpa [#allocation4], 0  ;;  %s13_s8 = sshll.u32 %s175_s0, 4  ;;  %s153_s9 = smov [#allocation2]   ;;  %s14_s8 = int_to_ptr.hbm [resolvable:$true] %s13_s8 }
   0x2   :  { %s15_s10 = sshll.u32 %s153_s9, 4  ;;  %s16_s10 = int_to_ptr.vmem [resolvable:$true] %s15_s10 }
   0x3   :  { %18 = dma.hbm_to_vmem [thread:$0]  %s14_s8, 256, %s16_s10, [#allocation3]  }
   0x4   :  { %149 = dma.done.wait [#allocation3], 256  }
   0x5   :  { %150 = vsyncadd [#allocation3], 4294967040  ;;  %v29_v0 = vld [vmem:[#allocation2] sm:$0xff]  ;;  %v30_v1 = vld [vmem:[#allocation2 + $0x8] sm:$0xff]  ;;  %vm27_vm0 = vcmask 64512   ;;  %v154_v2 = vmov 0.0  }
   0x6   :  { %47 = vmatpush.xpose.msra.mxu0 %v29_v0  ;;  %67 = vmatpush.xpose.msra.mxu1 %v30_v1  ;;  %28 = vst.msk [vmem:[#allocation5] sm:$0xff] %vm27_vm0, %v154_v2  ;;  %s155_s0 = smov [#allocation5]   ;;  %s88_s14 = sshll.u32 %s176_s1, 4  ;;  %s89_s14 = int_to_ptr.hbm [resolvable:$true] %s88_s14 }
   0x7   :  { %s86_s11 = sshll.u32 %s155_s0, 4  ;;  %s87_s11 = int_to_ptr.vmem [resolvable:$true] %s86_s11 }
   0x9   :  { %48 = vmatmul.f32.vlgmr.msra.gmra.mxu0 %v29_v0  ;;  %68 = vmatmul.f32.vlgmr.msra.gmra.mxu1 %v30_v1 }
   0xd   :  { %v31_v4 = vld [vmem:[#allocation5] sm:$0xff] }
  0x86   :  { %v49_v3 = vpop.f32.mrf.mxu0  ;;  %v69_v5 = vpop.f32.mrf.mxu1 }
  0x87   :  { %v70_v6 = vadd.f32 %v69_v5, %v49_v3 }
  0x89   :  { %v72_v7 = vadd.f32 %v70_v6, %v31_v4 }
  0x8b   :  { %74 = vst.msk [vmem:[#allocation5] sm:$0xff] %vm27_vm0, %v72_v7 }
  0x92   :  { %v78_v8 = vld [vmem:[#allocation5] sm:$0xff] }
  0x93   :  { %v79_v9 = vmul.f32 0.00048828125, %v78_v8 }
  0x95   :  { %80 = vst.msk [vmem:[#allocation5] sm:$0xff] %vm27_vm0, %v79_v9 }
  0x96   :  { %91 = dma.vmem_to_hbm [thread:$0]  %s87_s11, 128, %s89_s14, [#allocation4]  }
  0x97   :  { %151 = dma.done.wait [#allocation4], 128  }
  0x98   :  { %152 = vsyncadd [#allocation4], 4294967168 }
  0x99   :  { %96 = vsyncpa [#allocation3], 1 }
  0x9a   :  { %97 = vsyncpa [#allocation4], 1 }

</bundles_post_ra>
